<compile_context>
chip_gen: v7x
topology: tpu7x:2x2x1
jax: 0.10.0
libtpu: 0.0.40
codegen_flags: <defaults>
</compile_context>

<pallas_src>
import jax
import jax.numpy as jnp
from jax.experimental import pallas as pl
from jax.experimental.pallas import tpu as pltpu

LANE = 128  # lane width / padded hidden width


def xor_mlp_kernel(x_ref, w1_ref, b1_ref, w2row_ref, b2_ref, out_ref):
    x = x_ref[...].astype(jnp.float32)                     # (tb, 2)
    # Layer 1: K == 2 -> two VPU broadcast-mul-adds (no MXU round-trip needed).
    l1 = (x[:, 0:1] * w1_ref[0:1, :]
          + x[:, 1:2] * w1_ref[1:2, :]
          + b1_ref[...])                                   # (tb, 128), f32
    nl = jnp.maximum(l1, 0.0)                              # ReLU on the VPU
    # Layer 2: out_features == 1 -> VPU multiply + XLU lane reduce.  Padded
    # hidden columns are zero in w2row so they contribute nothing.
    l2 = jnp.sum(nl * w2row_ref[...], axis=-1, keepdims=True) + b2_ref[0, 0]
    out_ref[...] = l2.astype(out_ref.dtype)                # narrow (tb, 1) store


def xor_forward(x, w1, b1, w2, b2, *, tb=None):
    """x: (B, 2); w1: (2, H); b1: (1, H) or (H,); w2: (H, 1); b2: (1, 1) or (1,)."""
    B, in_features = x.shape
    hidden = w1.shape[1]

    # One-time weight prep: zero-pad the hidden dim to a lane-dense 128 tile.
    w1p = jnp.zeros((in_features, LANE), jnp.float32).at[:, :hidden].set(
        w1.astype(jnp.float32))
    b1p = jnp.zeros((1, LANE), jnp.float32).at[:, :hidden].set(
        b1.reshape(1, hidden).astype(jnp.float32))
    w2row = jnp.zeros((1, LANE), jnp.float32).at[:, :hidden].set(
        w2.reshape(1, hidden).astype(jnp.float32))
    b2p = b2.reshape(1, 1).astype(jnp.float32)

    # Batch tiling: single step for small B; large tiles (and >= 2 steps for
    # the v7x megacore) otherwise.  Ragged last tile handled by the cdiv grid.
    if tb is None:
        tb = B if B <= 512 else min(4096, pl.cdiv(B, 2))
    if tb >= B:
        tb = B                                  # single full-batch tile
    else:
        tb = max(8, (tb // 8) * 8)              # sublane-aligned partial tiles
    grid = (pl.cdiv(B, tb),)

    return pl.pallas_call(
        xor_mlp_kernel,
        out_shape=jax.ShapeDtypeStruct((B, 1), x.dtype),
        grid_spec=pltpu.PrefetchScalarGridSpec(
            num_scalar_prefetch=0,
            grid=grid,
            in_specs=[
                pl.BlockSpec((tb, in_features), lambda i: (i, 0)),    # x tile
                pl.BlockSpec((in_features, LANE), lambda i: (0, 0)),  # w1 (resident)
                pl.BlockSpec((1, LANE), lambda i: (0, 0)),            # b1 (resident)
                pl.BlockSpec((1, LANE), lambda i: (0, 0)),            # w2 row (resident)
                pl.BlockSpec(memory_space=pltpu.MemorySpace.SMEM),    # b2 scalar
            ],
            out_specs=pl.BlockSpec((tb, 1), lambda i: (i, 0)),
        ),
        compiler_params=pltpu.CompilerParams(
            dimension_semantics=("parallel",)),
    )(x, w1p, b1p, w2row, b2p)


def init_params(key):
    """Deterministic init mimicking nn.Linear default (uniform +/- 1/sqrt(fan_in))."""
    k1, k2, k3, k4 = jax.random.split(key, 4)
    in1, hid, out = 2, 50, 1
    bound1 = 1.0 / jnp.sqrt(in1)
    bound2 = 1.0 / jnp.sqrt(hid)
    w1 = jax.random.uniform(k1, (in1, hid), jnp.float32, -bound1, bound1)
    b1 = jax.random.uniform(k2, (1, hid), jnp.float32, -bound1, bound1)
    w2 = jax.random.uniform(k3, (hid, out), jnp.float32, -bound2, bound2)
    b2 = jax.random.uniform(k4, (1, out), jnp.float32, -bound2, bound2)
    return w1, b1, w2, b2


if __name__ == "__main__":
    key = jax.random.PRNGKey(0)
    kx, kp = jax.random.split(key)
    w1, b1, w2, b2 = init_params(kp)

    # Small-shape path (single grid step, block == full array).
    batch = 8
    x = jax.random.normal(kx, (batch, 2), jnp.float32)
    out = jax.block_until_ready(xor_forward(x, w1, b1, w2, b2))
    ref = jnp.maximum(x @ w1 + b1, 0.0) @ w2 + b2
    assert out.shape == (batch, 1), out.shape
    assert jnp.allclose(out, ref, atol=1e-5, rtol=1e-5)

    # Multi-step grid with a ragged last tile (no host-side padding of x).
    x2 = jax.random.normal(kx, (300, 2), jnp.float32)
    out2 = jax.block_until_ready(xor_forward(x2, w1, b1, w2, b2, tb=128))
    ref2 = jnp.maximum(x2 @ w1 + b1, 0.0) @ w2 + b2
    assert out2.shape == (300, 1), out2.shape
    assert jnp.allclose(out2, ref2, atol=1e-5, rtol=1e-5)

    print("KERNEL_OK")
</pallas_src>

<mosaic_0001>
module attributes {stable_mosaic.version = 11 : i64} {
  func.func @xor_mlp_kernel(%arg0: i32, %arg1: memref<8x2xf32, #tpu.memory_space<vmem>>, %arg2: memref<2x128xf32, #tpu.memory_space<vmem>>, %arg3: memref<1x128xf32, #tpu.memory_space<vmem>>, %arg4: memref<1x128xf32, #tpu.memory_space<vmem>>, %arg5: memref<1x1xf32, #tpu.memory_space<smem>>, %arg6: memref<8x1xf32, #tpu.memory_space<vmem>>) attributes {dimension_semantics = [#tpu.dimension_semantics<parallel>], iteration_bounds = array<i64: 1>, scalar_prefetch = 0 : i64, scratch_operands = 0 : i64, tpu.core_type = #tpu.core_type<tc>, window_params = [{transform_indices = @transform_0, window_bounds = array<i64: 8, 2>}, {pipeline_mode = #tpu.pipeline_mode<synchronous>, transform_indices = @transform_1, window_bounds = array<i64: 2, 128>}, {pipeline_mode = #tpu.pipeline_mode<synchronous>, transform_indices = @transform_2, window_bounds = array<i64: 1, 128>}, {pipeline_mode = #tpu.pipeline_mode<synchronous>, transform_indices = @transform_3, window_bounds = array<i64: 1, 128>}, {transform_indices = @transform_4, window_bounds = array<i64: 1, 1>}, {transform_indices = @transform_5, window_bounds = array<i64: 8, 1>}]} {
    %c0 = arith.constant 0 : index
    %c0_0 = arith.constant 0 : index
    %0 = vector.load %arg1[%c0, %c0_0] : memref<8x2xf32, #tpu.memory_space<vmem>>, vector<8x2xf32>
    %1 = vector.extract_strided_slice %0 {offsets = [0, 0], sizes = [8, 1], strides = [1, 1]} : vector<8x2xf32> to vector<8x1xf32>
    %c0_1 = arith.constant 0 : index
    %c0_2 = arith.constant 0 : index
    %2 = vector.load %arg2[%c0_1, %c0_2] : memref<2x128xf32, #tpu.memory_space<vmem>>, vector<1x128xf32>
    %3 = vector.broadcast %1 : vector<8x1xf32> to vector<8x128xf32>
    %4 = vector.broadcast %2 : vector<1x128xf32> to vector<8x128xf32>
    %5 = arith.mulf %3, %4 : vector<8x128xf32>
    %6 = vector.extract_strided_slice %0 {offsets = [0, 1], sizes = [8, 1], strides = [1, 1]} : vector<8x2xf32> to vector<8x1xf32>
    %c1 = arith.constant 1 : index
    %c0_3 = arith.constant 0 : index
    %7 = vector.load %arg2[%c1, %c0_3] : memref<2x128xf32, #tpu.memory_space<vmem>>, vector<1x128xf32>
    %8 = vector.broadcast %6 : vector<8x1xf32> to vector<8x128xf32>
    %9 = vector.broadcast %7 : vector<1x128xf32> to vector<8x128xf32>
    %10 = arith.mulf %8, %9 : vector<8x128xf32>
    %11 = arith.addf %5, %10 : vector<8x128xf32>
    %c0_4 = arith.constant 0 : index
    %c0_5 = arith.constant 0 : index
    %12 = vector.load %arg3[%c0_4, %c0_5] : memref<1x128xf32, #tpu.memory_space<vmem>>, vector<1x128xf32>
    %13 = vector.broadcast %12 : vector<1x128xf32> to vector<8x128xf32>
    %14 = arith.addf %11, %13 : vector<8x128xf32>
    %cst = arith.constant 0.000000e+00 : f32
    %15 = vector.broadcast %cst : f32 to vector<8x128xf32>
    %16 = arith.maximumf %14, %15 : vector<8x128xf32>
    %c0_6 = arith.constant 0 : index
    %c0_7 = arith.constant 0 : index
    %17 = vector.load %arg4[%c0_6, %c0_7] : memref<1x128xf32, #tpu.memory_space<vmem>>, vector<1x128xf32>
    %18 = vector.broadcast %17 : vector<1x128xf32> to vector<8x128xf32>
    %19 = arith.mulf %16, %18 : vector<8x128xf32>
    %cst_8 = arith.constant dense<0.000000e+00> : vector<8xf32>
    %20 = vector.multi_reduction <add>, %19, %cst_8 [1] : vector<8x128xf32> to vector<8xf32>
    %21 = vector.shape_cast %20 : vector<8xf32> to vector<8x1xf32>
    %c0_9 = arith.constant 0 : index
    %c0_10 = arith.constant 0 : index
    %22 = memref.load %arg5[%c0_9, %c0_10] : memref<1x1xf32, #tpu.memory_space<smem>>
    %23 = vector.broadcast %22 : f32 to vector<8x1xf32>
    %24 = arith.addf %21, %23 : vector<8x1xf32>
    %c0_11 = arith.constant 0 : index
    %c0_12 = arith.constant 0 : index
    %25 = vector.load %arg6[%c0_11, %c0_12] : memref<8x1xf32, #tpu.memory_space<vmem>>, vector<8x1xf32>
    tpu.vector_store %arg6[%c0_11, %c0_12], %24 {strides = array<i32>} : memref<8x1xf32, #tpu.memory_space<vmem>>, vector<8x1xf32>,
    return
  }
  func.func @transform_0(%arg0: i32) -> (i32, i32) {
    %c0_i32 = arith.constant 0 : i32
    %c0_i32_0 = arith.constant 0 : i32
    return %arg0, %c0_i32 : i32, i32
  }
  func.func @transform_1(%arg0: i32) -> (i32, i32) {
    %c0_i32 = arith.constant 0 : i32
    %c0_i32_0 = arith.constant 0 : i32
    %c0_i32_1 = arith.constant 0 : i32
    return %c0_i32, %c0_i32_0 : i32, i32
  }
  func.func @transform_2(%arg0: i32) -> (i32, i32) {
    %c0_i32 = arith.constant 0 : i32
    %c0_i32_0 = arith.constant 0 : i32
    %c0_i32_1 = arith.constant 0 : i32
    return %c0_i32, %c0_i32_0 : i32, i32
  }
  func.func @transform_3(%arg0: i32) -> (i32, i32) {
    %c0_i32 = arith.constant 0 : i32
    %c0_i32_0 = arith.constant 0 : i32
    %c0_i32_1 = arith.constant 0 : i32
    return %c0_i32, %c0_i32_0 : i32, i32
  }
  func.func @transform_4(%arg0: i32) -> (i32, i32) {
    %c0_i32 = arith.constant 0 : i32
    %c0_i32_0 = arith.constant 0 : i32
    %c0_i32_1 = arith.constant 0 : i32
    return %c0_i32, %c0_i32_0 : i32, i32
  }
  func.func @transform_5(%arg0: i32) -> (i32, i32) {
    %c0_i32 = arith.constant 0 : i32
    %c0_i32_0 = arith.constant 0 : i32
    return %arg0, %c0_i32 : i32, i32
  }
}

</mosaic_0001>

<bundles_post_ra>
// kernel: tpu_custom_call.1
= control target key start
LH: loop header
LB: loop body
LE: loop exit
PB: predicated region body
PF: predicated region fallthrough
CT: control target
= control target key end

     0   :  { %v80_v0 = vmov 0   ;;  %v81_v2 = vmov 1   ;;  %vm66_vm0 = vcmask 7168   ;;  %s133_s0 = inlined_call_operand.vmem [shape: f32[8,2], index: 0, kind: input, shape index: {}]   ;;  %s134_s1 = inlined_call_operand.vmem [shape: f32[2,128], index: 1, kind: input, shape index: {}]   ;;  %s135_s2 = inlined_call_operand.vmem [shape: f32[1,128], index: 2, kind: input, shape index: {}]   ;;  %s136_s3 = inlined_call_operand.vmem [shape: f32[1,128], index: 3, kind: input, shape index: {}]   ;;  %s137_s4 = inlined_call_operand.<no memory space> [shape: f32[1,1], index: 4, kind: input, shape index: {}]   ;;  %s138_s5 = inlined_call_operand.vmem [shape: f32[8,1], index: 5, kind: output, shape index: {}]  }
   0x1   :  { %78 = vset.pattern.permute.xlu0 %v80_v0  ;;  %v21_v1 = vld [vmem:[%s133_s0] sm:$0xff]  ;;  %v64_v15 = vstv %s137_s4 }
   0x2   :  { %25 = vperm.xlu0 %78, %v21_v1   ;;  %v72_v4 = vld [vmem:[%s134_s1] ss:$0 sm:$0xff]  ;;  %v73_v5 = vld [vmem:[%s134_s1 + $0x1] ss:$0 sm:$0xff] }
   0x3   :  { %v74_v9 = vld [vmem:[%s135_s2] ss:$0 sm:$0xff] }
   0x4   :  { %v75_v12 = vld [vmem:[%s136_s3] ss:$0 sm:$0xff] }
   0x6   :  { %79 = vset.pattern.permute.xlu0 %v81_v2 }
   0x7   :  { %35 = vperm.xlu0 %79, %v21_v1  }
  0x81   :  { %v26_v3 = vpop.permute.xlu0 %25 }
  0x82   :  { %v32_v7 = vmul.f32 %v72_v4, %v26_v3 }
  0x86   :  { %v36_v6 = vpop.permute.xlu0 %35 }
  0x87   :  { %v42_v8 = vmul.f32 %v73_v5, %v36_v6 }
  0x89   :  { %v43_v10 = vadd.f32 %v42_v8, %v32_v7 }
  0x8b   :  { %v51_v11 = vadd.f32 %v74_v9, %v43_v10 }
  0x8d   :  { %v52_v13 = vmax.f32 %v51_v11, 0.0 }
  0x8f   :  { %v60_v14 = vmul.f32 %v75_v12, %v52_v13 }
  0x91   :  { %61 = vadd.xlane.f32.xlu1 %v60_v14 }
 0x11e   :  { %v62_v16 = vpop.xlane.xlu1 %61 }
 0x11f   :  { %v65_v17 = vadd.f32 %v64_v15, %v62_v16 }
 0x121   :  { %67 = vst.msk [vmem:[%s138_s5] sm:$0xff] %vm66_vm0, %v65_v17 }

</bundles_post_ra>
